<compile_context>
chip_gen: v7x
topology: tpu7x:2x2x1
jax: 0.10.0
libtpu: 0.0.40
codegen_flags: <defaults>
</compile_context>

<pallas_src>
import functools

import jax
import jax.numpy as jnp
from jax import lax
from jax.experimental import pallas as pl
from jax.experimental.pallas import tpu as pltpu


_VMEM_LIMIT = 48 << 20  # > default scoped VMEM on v5e/v6e/v7x, < v7x physical 64 MiB


def _round_up(a, m):
    return (a + m - 1) // m * m


# ---------------------------------------------------------------------------
# Fused linear (+bias) kernel.  Grid = (row tiles, column tiles); the weight
# block holds the full contraction dim (ViT dims fit VMEM easily) and only the
# current column tile, keeping output stores lane-dense.
# ---------------------------------------------------------------------------
def _linear_bias_kernel(x_ref, w_ref, b_ref, o_ref):
    acc = jnp.dot(x_ref[...], w_ref[...], preferred_element_type=jnp.float32)
    o_ref[...] = (acc + b_ref[...]).astype(o_ref.dtype)


def _pick_col_tile(n):
    # Largest "nice" (multiple-of-128) divisor of n; else the full dim.
    for cand in (2048, 1536, 1024, 768, 512, 384, 256, 128):
        if n % cand == 0:
            return cand
    return n


def linear_pallas(x, w, b, *, tm=256):
    """x: (M, K); w: (K, N) (already transposed to in x out); b: (N,)."""
    M, K = x.shape
    Kw, N = w.shape
    assert K == Kw
    # Big row tile feeds the MXU; clamp for small problems and pad the token
    # axis so any M works (padded rows are sliced off afterwards).
    tm = min(tm, _round_up(M, 8))
    Mp = _round_up(M, tm)
    if Mp != M:
        x = jnp.pad(x, ((0, Mp - M), (0, 0)))
    tn = _pick_col_tile(N)

    out = pl.pallas_call(
        _linear_bias_kernel,
        out_shape=jax.ShapeDtypeStruct((Mp, N), x.dtype),
        grid_spec=pltpu.PrefetchScalarGridSpec(
            num_scalar_prefetch=0,
            grid=(Mp // tm, N // tn),
            in_specs=[
                pl.BlockSpec((tm, K), lambda i, j: (i, 0)),   # token tile
                pl.BlockSpec((K, tn), lambda i, j: (0, j)),   # weight column tile
                pl.BlockSpec((1, tn), lambda i, j: (0, j)),   # bias slice
            ],
            out_specs=pl.BlockSpec((tm, tn), lambda i, j: (i, j)),
        ),
        compiler_params=pltpu.CompilerParams(
            dimension_semantics=("parallel", "parallel"),
            vmem_limit_bytes=_VMEM_LIMIT,
        ),
    )(x, w, b.reshape(1, N))
    return out[:M] if Mp != M else out


# ---------------------------------------------------------------------------
# Flash-attention kernel (online softmax) over head groups.
# Grid = (BH//G, q_tiles, kv_tiles); each step handles G (batch*head) slices.
# kv axis is the innermost reduction ("arbitrary"); f32 scratch accumulators.
# ---------------------------------------------------------------------------
def _flash_attn_kernel(q_ref, k_ref, v_ref, o_ref, m_sc, l_sc, acc_sc, *,
                       scale, kv_len, tk, masked):
    ki = pl.program_id(2)

    @pl.when(ki == 0)
    def _():
        m_sc[...] = jnp.full(m_sc.shape, -jnp.inf, jnp.float32)
        l_sc[...] = jnp.zeros(l_sc.shape, jnp.float32)
        acc_sc[...] = jnp.zeros(acc_sc.shape, jnp.float32)

    # scores for this (group, q tile, kv tile): (G, tq, tk), f32 accumulate on MXU
    s = jnp.einsum("gqd,gkd->gqk", q_ref[...], k_ref[...],
                   preferred_element_type=jnp.float32) * scale

    if masked:  # static flag: only emitted when the key axis was padded
        col = ki * tk + lax.broadcasted_iota(jnp.int32, s.shape, 2)
        s = jnp.where(col < kv_len, s, -1e30)

    m_new = jnp.maximum(m_sc[...], s.max(axis=-1, keepdims=True))
    alpha = jnp.exp(m_sc[...] - m_new)
    p = jnp.exp(s - m_new)
    l_sc[...] = alpha * l_sc[...] + p.sum(axis=-1, keepdims=True)
    acc_sc[...] = alpha * acc_sc[...] + jnp.einsum(
        "gqk,gkd->gqd", p.astype(v_ref.dtype), v_ref[...],
        preferred_element_type=jnp.float32)
    m_sc[...] = m_new

    @pl.when(ki == pl.num_programs(2) - 1)
    def _():
        inv_l = 1.0 / l_sc[...]                      # (G, tq, 1) then broadcast-mul
        o_ref[...] = (acc_sc[...] * inv_l).astype(o_ref.dtype)


def flash_attention_pallas(q, k, v, scale, *, tq=128, tk=128, max_group=8):
    """q, k, v: (B*H, N, head_dim) -> (B*H, N, head_dim)."""
    BH, N, hd = q.shape
    tq = min(tq, _round_up(N, 8))
    tk = min(tk, _round_up(N, 8))
    Nq = _round_up(N, tq)
    Nk = _round_up(N, tk)
    if Nq != N:  # padded query rows are garbage but independent; sliced off below
        q = jnp.pad(q, ((0, 0), (0, Nq - N), (0, 0)))
    if Nk != N:  # padded keys are masked out inside the kernel
        k = jnp.pad(k, ((0, 0), (0, Nk - N), (0, 0)))
        v = jnp.pad(v, ((0, 0), (0, Nk - N), (0, 0)))

    # head-group size: largest divisor of BH not exceeding max_group
    g = min(BH, max_group)
    while BH % g:
        g -= 1

    kernel = functools.partial(_flash_attn_kernel, scale=scale, kv_len=N,
                               tk=tk, masked=(Nk != N))
    out = pl.pallas_call(
        kernel,
        out_shape=jax.ShapeDtypeStruct((BH, Nq, hd), q.dtype),
        grid_spec=pltpu.PrefetchScalarGridSpec(
            num_scalar_prefetch=0,
            grid=(BH // g, Nq // tq, Nk // tk),
            in_specs=[
                pl.BlockSpec((g, tq, hd), lambda b, qi, ki: (b, qi, 0)),
                pl.BlockSpec((g, tk, hd), lambda b, qi, ki: (b, ki, 0)),
                pl.BlockSpec((g, tk, hd), lambda b, qi, ki: (b, ki, 0)),
            ],
            out_specs=pl.BlockSpec((g, tq, hd), lambda b, qi, ki: (b, qi, 0)),
            scratch_shapes=[
                pltpu.VMEM((g, tq, 1), jnp.float32),   # running max
                pltpu.VMEM((g, tq, 1), jnp.float32),   # running denominator
                pltpu.VMEM((g, tq, hd), jnp.float32),  # output accumulator
            ],
        ),
        compiler_params=pltpu.CompilerParams(
            dimension_semantics=("parallel", "parallel", "arbitrary"),
            vmem_limit_bytes=_VMEM_LIMIT,
        ),
    )(q, k, v)
    return out[:, :N, :] if Nq != N else out


# ---------------------------------------------------------------------------
# Full Attention forward (matches the PyTorch module semantics).
# ---------------------------------------------------------------------------
def attention_forward(x, params, *, num_heads, tm=256, tq=128, tk=128):
    B, N, C = x.shape
    assert C % num_heads == 0
    hd = C // num_heads
    scale = float(hd) ** -0.5
    M = B * N

    # 1) fused QKV projection  (M, C) @ (C, 3C) + b
    qkv = linear_pallas(x.reshape(M, C), params["w_qkv"], params["b_qkv"], tm=tm)

    # 2) split heads (pure layout ops, left to XLA; cheap at ViT sizes)
    qkv = qkv.reshape(B, N, 3, num_heads, hd).transpose(2, 0, 3, 1, 4)
    q = qkv[0].reshape(B * num_heads, N, hd)
    k = qkv[1].reshape(B * num_heads, N, hd)
    v = qkv[2].reshape(B * num_heads, N, hd)

    # 3) softmax(q k^T * scale) @ v   via grouped flash-attention kernel
    o = flash_attention_pallas(q, k, v, scale, tq=tq, tk=tk)
    # TODO(synk): attn_drop defaults to 0.0 -> identity; RNG dropout not implemented.

    # 4) merge heads  +  5) output projection
    o = o.reshape(B, num_heads, N, hd).transpose(0, 2, 1, 3).reshape(M, C)
    y = linear_pallas(o, params["w_proj"], params["b_proj"], tm=tm)
    # TODO(synk): proj_drop defaults to 0.0 -> identity.
    return y.reshape(B, N, C)


# ---------------------------------------------------------------------------
# Parameters (shapes follow nn.Linear: weight (out, in) -> stored as (in, out))
# and a pure-JAX reference for verification.
# ---------------------------------------------------------------------------
def init_params(key, dim, qkv_bias=False, dtype=jnp.float32):
    k1, k2, k3, k4 = jax.random.split(key, 4)
    w_qkv = (jax.random.normal(k1, (3 * dim, dim), dtype) * 0.02).T   # (dim, 3*dim)
    b_qkv = (jax.random.normal(k2, (3 * dim,), dtype) * 0.02
             if qkv_bias else jnp.zeros((3 * dim,), dtype))
    w_proj = (jax.random.normal(k3, (dim, dim), dtype) * 0.02).T      # (dim, dim)
    b_proj = jax.random.normal(k4, (dim,), dtype) * 0.02
    return {"w_qkv": w_qkv, "b_qkv": b_qkv, "w_proj": w_proj, "b_proj": b_proj}


def attention_reference(x, params, *, num_heads):
    B, N, C = x.shape
    hd = C // num_heads
    scale = float(hd) ** -0.5
    qkv = jnp.einsum("bnc,cd->bnd", x, params["w_qkv"]) + params["b_qkv"]
    qkv = qkv.reshape(B, N, 3, num_heads, hd).transpose(2, 0, 3, 1, 4)
    q, k, v = qkv[0], qkv[1], qkv[2]
    attn = jnp.einsum("bhqd,bhkd->bhqk", q, k) * scale
    attn = jax.nn.softmax(attn, axis=-1)
    o = jnp.einsum("bhqk,bhkd->bhqd", attn, v)
    o = o.transpose(0, 2, 1, 3).reshape(B, N, C)
    return jnp.einsum("bnc,cd->bnd", o, params["w_proj"]) + params["b_proj"]


if __name__ == "__main__":
    key = jax.random.PRNGKey(0)
    B, N, C = 2, 16, 128      # batch, tokens, embed dim (lane-dense: C % 128 == 0)
    num_heads = 8             # head_dim = 16

    kx, kp = jax.random.split(key)
    x = jax.random.normal(kx, (B, N, C), jnp.float32)
    params = init_params(kp, C, qkv_bias=False)

    # f32 run + correctness check against the pure-JAX reference
    y = attention_forward(x, params, num_heads=num_heads)
    jax.block_until_ready(y)
    y_ref = attention_reference(x, params, num_heads=num_heads)
    assert y.shape == (B, N, C)
    assert jnp.allclose(y, y_ref, atol=1e-5, rtol=1e-5), "mismatch vs reference"

    # bf16 smoke run (the fast MXU path recommended for v6e/v7x); f32 accumulate.
    xb = x.astype(jnp.bfloat16)
    pb = jax.tree_util.tree_map(lambda p: p.astype(jnp.bfloat16), params)
    yb = attention_forward(xb, pb, num_heads=num_heads)
    jax.block_until_ready(yb)

    print("KERNEL_OK")
</pallas_src>

<mosaic_0001>
module attributes {stable_mosaic.version = 11 : i64} {
  func.func @_linear_bias_kernel(%arg0: i32, %arg1: i32, %arg2: memref<32x128xf32, #tpu.memory_space<vmem>>, %arg3: memref<128x384xf32, #tpu.memory_space<vmem>>, %arg4: memref<1x384xf32, #tpu.memory_space<vmem>>, %arg5: memref<32x384xf32, #tpu.memory_space<vmem>>) attributes {dimension_semantics = [#tpu.dimension_semantics<parallel>, #tpu.dimension_semantics<parallel>], iteration_bounds = array<i64: 1, 1>, scalar_prefetch = 0 : i64, scratch_operands = 0 : i64, tpu.core_type = #tpu.core_type<tc>, window_params = [{transform_indices = @transform_0, window_bounds = array<i64: 32, 128>}, {transform_indices = @transform_1, window_bounds = array<i64: 128, 384>}, {transform_indices = @transform_2, window_bounds = array<i64: 1, 384>}, {transform_indices = @transform_3, window_bounds = array<i64: 32, 384>}]} {
    %c0 = arith.constant 0 : index
    %c0_0 = arith.constant 0 : index
    %0 = vector.load %arg2[%c0, %c0_0] : memref<32x128xf32, #tpu.memory_space<vmem>>, vector<32x128xf32>
    %c0_1 = arith.constant 0 : index
    %c0_2 = arith.constant 0 : index
    %1 = vector.load %arg3[%c0_1, %c0_2] : memref<128x384xf32, #tpu.memory_space<vmem>>, vector<128x384xf32>
    %cst = arith.constant dense<0.000000e+00> : vector<32x384xf32>
    %2 = tpu.matmul %0, %1, %cst {dimension_numbers = #tpu.dot_dimension_numbers<[1], [0], [0], [1], [0, 0, 1, 1], [], []>} : vector<32x128xf32>, vector<128x384xf32>, vector<32x384xf32> -> vector<32x384xf32>
    %c0_3 = arith.constant 0 : index
    %c0_4 = arith.constant 0 : index
    %3 = vector.load %arg4[%c0_3, %c0_4] : memref<1x384xf32, #tpu.memory_space<vmem>>, vector<1x384xf32>
    %4 = vector.broadcast %3 : vector<1x384xf32> to vector<32x384xf32>
    %5 = arith.addf %2, %4 : vector<32x384xf32>
    %c0_5 = arith.constant 0 : index
    %c0_6 = arith.constant 0 : index
    %6 = vector.load %arg5[%c0_5, %c0_6] : memref<32x384xf32, #tpu.memory_space<vmem>>, vector<32x384xf32>
    tpu.vector_store %arg5[%c0_5, %c0_6], %5 {strides = array<i32>} : memref<32x384xf32, #tpu.memory_space<vmem>>, vector<32x384xf32>,
    return
  }
  func.func @transform_0(%arg0: i32, %arg1: i32) -> (i32, i32) {
    %c0_i32 = arith.constant 0 : i32
    %c0_i32_0 = arith.constant 0 : i32
    return %arg0, %c0_i32 : i32, i32
  }
  func.func @transform_1(%arg0: i32, %arg1: i32) -> (i32, i32) {
    %c0_i32 = arith.constant 0 : i32
    %c0_i32_0 = arith.constant 0 : i32
    return %c0_i32, %arg1 : i32, i32
  }
  func.func @transform_2(%arg0: i32, %arg1: i32) -> (i32, i32) {
    %c0_i32 = arith.constant 0 : i32
    %c0_i32_0 = arith.constant 0 : i32
    return %c0_i32, %arg1 : i32, i32
  }
  func.func @transform_3(%arg0: i32, %arg1: i32) -> (i32, i32) {
    %c0_i32 = arith.constant 0 : i32
    return %arg0, %arg1 : i32, i32
  }
}

</mosaic_0001>

<bundles_post_ra>
// kernel: tpu_custom_call.1
= control target key start
LH: loop header
LB: loop body
LE: loop exit
PB: predicated region body
PF: predicated region fallthrough
CT: control target
= control target key end

     0   :  { %8 = vsyncpa [#allocation3], 0  ;;  %s595_s0 = inlined_call_operand.hbm [shape: f32[32,128], index: 0, kind: input, shape index: {}]   ;;  %s596_s1 = inlined_call_operand.hbm [shape: f32[128,384], index: 1, kind: input, shape index: {}]   ;;  %s597_s2 = inlined_call_operand.vmem [shape: f32[1,384], index: 2, kind: input, shape index: {}]   ;;  %s598_s3 = inlined_call_operand.hbm [shape: f32[32,384], index: 3, kind: output, shape index: {}]  }
   0x1   :  { %9 = vsyncpa [#allocation6], 0 }
   0x2   :  { %10 = vsyncpa [#allocation4], 0  ;;  %s518_s12 = smov [#allocation2]   ;;  %s446_s16 = scalar_lea.hbm %s595_s0, 512 }
   0x3   :  { %s16_s13 = sshll.u32 %s518_s12, 4  ;;  %p447_p0 = scmp.ne.s32.totalorder %s595_s0, %s446_s16  ;;  %s17_s13 = int_to_ptr.vmem [resolvable:$true] %s16_s13 }
   0x4   :  { %p450_p1 = scmp.lt.u32.totalorder %s446_s16, %s595_s0 }
   0x6   :  { %p452_p2 = pnand %p450_p1, %p447_p0 }
   0x8   :  { %455 = shalt.err (!%p452_p2)
}
   0x9   :  { %s456_s21 = scalar_lea.vmem %s17_s13, 512  ;;  %p461_p4 = scmp.lt.s32.totalorder %s17_s13, %s17_s13 }
   0xa   :  { %p457_p3 = scmp.ne.s32.totalorder %s17_s13, %s456_s21  ;;  %p462_p5 = scmp.lt.s32.totalorder %s456_s21, %s456_s21 }
   0xc   :  { %p463_p6 = por %p462_p5, %p461_p4 }
   0xe   :  { %p464_p7 = pnand %p463_p6, %p457_p3 }
  0x10   :  { %467 = shalt.err (!%p464_p7)
}
  0x11   :  { %s519_s22 = smov 128   ;;  %s520_s23 = smov 8  }
  0x12   :  { %22 = dma.hbm_to_vmem [thread:$0]  %s595_s0, 512, %s17_s13, [#allocation3], %s519_s22, %s519_s22, %s520_s23  }
  0x13   :  { %s521_s26 = smov [#allocation5]   ;;  %s468_s30 = scalar_lea.hbm %s596_s1, 6144 }
  0x14   :  { %s28_s27 = sshll.u32 %s521_s26, 4  ;;  %p469_p8 = scmp.ne.s32.totalorder %s596_s1, %s468_s30  ;;  %s29_s27 = int_to_ptr.vmem [resolvable:$true] %s28_s27 }
  0x15   :  { %p472_p9 = scmp.lt.u32.totalorder %s468_s30, %s596_s1 }
  0x17   :  { %p474_p10 = pnand %p472_p9, %p469_p8 }
  0x19   :  { %477 = shalt.err (!%p474_p10)
}
  0x1a   :  { %s478_s8 = scalar_lea.vmem %s29_s27, 6144  ;;  %p483_p12 = scmp.lt.s32.totalorder %s29_s27, %s29_s27 }
  0x1b   :  { %p479_p11 = scmp.ne.s32.totalorder %s29_s27, %s478_s8  ;;  %p484_p13 = scmp.lt.s32.totalorder %s478_s8, %s478_s8 }
  0x1d   :  { %p485_p0 = por %p484_p13, %p483_p12 }
  0x1f   :  { %p486_p1 = pnand %p485_p0, %p479_p11 }
  0x21   :  { %489 = shalt.err (!%p486_p1)
}
  0x22   :  { %s522_s0 = smov 384   ;;  %s523_s9 = smov 24  }
  0x23   :  { %34 = dma.hbm_to_vmem [thread:$0]  %s596_s1, 6144, %s29_s27, [#allocation6], %s522_s0, %s522_s0, %s523_s9  }
  0x24   :  { %512 = dma.done.wait [#allocation3], 512  }
  0x25   :  { %513 = vsyncadd [#allocation3], 4294966784 }
  0x26   :  { %514 = dma.done.wait [#allocation6], 6144  }
  0x27   :  { %515 = vsyncadd [#allocation6], 4294961152  ;;  %v524_v0 = vmov 0.0   ;;  %v48_v1 = vld [vmem:[#allocation5 + $0x8] sm:$0xff]  ;;  %v51_v2 = vld [vmem:[#allocation5 + $0x20] sm:$0xff] }
  0x28   :  { %176 = vmatprep.mubr.f32.mxu0 %v524_v0  ;;  %v47_v3 = vld [vmem:[#allocation5] sm:$0xff]  ;;  %v374_v4 = vpack.c.bf16 %v51_v2, %v48_v1  ;;  %v50_v5 = vld [vmem:[#allocation5 + $0x18] sm:$0xff]  ;;  %v57_v7 = vld [vmem:[#allocation5 + $0x50] sm:$0xff] }
  0x29   :  { %v54_v6 = vld [vmem:[#allocation5 + $0x38] sm:$0xff]  ;;  %v376_v8 = vpack.c.bf16 %v50_v5, %v47_v3  ;;  %v53_v10 = vld [vmem:[#allocation5 + $0x30] sm:$0xff]  ;;  %v56_v11 = vld [vmem:[#allocation5 + $0x48] sm:$0xff] }
  0x2a   :  { %v378_v9 = vpack.c.bf16 %v57_v7, %v54_v6  ;;  %v49_v12 = vld [vmem:[#allocation5 + $0x10] sm:$0xff]  ;;  %375 = vmatprep.subr.bf16.mxu0 %v374_v4  ;;  %v52_v13 = vld [vmem:[#allocation5 + $0x28] sm:$0xff]  ;;  %v63_v15 = vld [vmem:[#allocation5 + $0x80] sm:$0xff]  ;;  %v380_v16 = vpack.c.bf16 %v56_v11, %v53_v10 }
  0x2b   :  { %v60_v14 = vld [vmem:[#allocation5 + $0x68] sm:$0xff]  ;;  %377 = vmatpush1.bf16.msra.mxu0 %v376_v8  ;;  %v406_v17 = vpack.c.bf16 %v52_v13, %v49_v12  ;;  %v55_v18 = vld [vmem:[#allocation5 + $0x40] sm:$0xff]  ;;  %v62_v21 = vld [vmem:[#allocation5 + $0x78] sm:$0xff] }
  0x2c   :  { %379 = vmatprep.subr.bf16.mxu0 %v378_v9  ;;  %v382_v19 = vpack.c.bf16 %v63_v15, %v60_v14  ;;  %v59_v20 = vld [vmem:[#allocation5 + $0x60] sm:$0xff]  ;;  %v58_v22 = vld [vmem:[#allocation5 + $0x58] sm:$0xff]  ;;  %v69_v25 = vld [vmem:[#allocation5 + $0xb0] sm:$0xff]  ;;  %v97_v14 = vlaneseq }
  0x2d   :  { %407 = vmatprep.subr.bf16.mxu1 %v406_v17  ;;  %v410_v23 = vpack.c.bf16 %v58_v22, %v55_v18  ;;  %v66_v24 = vld [vmem:[#allocation5 + $0x98] sm:$0xff]  ;;  %v61_v26 = vld [vmem:[#allocation5 + $0x70] sm:$0xff]  ;;  %v64_v27 = vld [vmem:[#allocation5 + $0x88] sm:$0xff]  ;;  %v384_v28 = vpack.c.bf16 %v62_v21, %v59_v20 }
  0x2e   :  { %409 = vmatpush3.bf16.msra.mxu1 %v406_v17  ;;  %v65_v29 = vld [vmem:[#allocation5 + $0x90] sm:$0xff]  ;;  %v414_v30 = vpack.c.bf16 %v64_v27, %v61_v26  ;;  %v386_v31 = vpack.c.bf16 %v69_v25, %v66_v24  ;;  %v68_v32 = vld [vmem:[#allocation5 + $0xa8] sm:$0xff]  ;;  %v67_v33 = vld [vmem:[#allocation5 + $0xa0] sm:$0xff]  ;;  %v98_v15 = vshrl.u32 %v97_v14, 7 }
  0x2f   :  { %381 = vmatpush1.bf16.msra.mxu0 %v380_v16  ;;  %411 = vmatprep.subr.bf16.mxu1 %v410_v23  ;;  %v70_v34 = vld [vmem:[#allocation5 + $0xb8] sm:$0xff]  ;;  %v72_v35 = vld [vmem:[#allocation5 + $0xc8] sm:$0xff]  ;;  %v75_v36 = vld [vmem:[#allocation5 + $0xe0] sm:$0xff]  ;;  %v388_v37 = vpack.c.bf16 %v68_v32, %v65_v29 }
  0x30   :  { %383 = vmatprep.subr.bf16.mxu0 %v382_v19  ;;  %v71_v38 = vld [vmem:[#allocation5 + $0xc0] sm:$0xff]  ;;  %v418_v39 = vpack.c.bf16 %v70_v34, %v67_v33  ;;  %v390_v40 = vpack.c.bf16 %v75_v36, %v72_v35  ;;  %v74_v41 = vld [vmem:[#allocation5 + $0xd8] sm:$0xff]  ;;  %v73_v42 = vld [vmem:[#allocation5 + $0xd0] sm:$0xff]  ;;  %v99_v16 = vsub.s32 0, %v98_v15  ;;  %v103_v18 = vsub.s32 1, %v98_v15 }
  0x31   :  { %v76_v43 = vld [vmem:[#allocation5 + $0xe8] sm:$0xff]  ;;  %v78_v44 = vld [vmem:[#allocation5 + $0xf8] sm:$0xff]  ;;  %v81_v45 = vld [vmem:[#allocation5 + $0x110] sm:$0xff]  ;;  %v392_v46 = vpack.c.bf16 %v74_v41, %v71_v38  ;;  %v107_v19 = vsub.s32 2, %v98_v15 }
  0x32   :  { %413 = vmatpush3.bf16.msra.mxu1 %v410_v23  ;;  %v77_v47 = vld [vmem:[#allocation5 + $0xf0] sm:$0xff]  ;;  %v422_v48 = vpack.c.bf16 %v76_v43, %v73_v42  ;;  %v43_v49 = vld [vmem:[#allocation2] sm:$0xff]  ;;  %v394_v50 = vpack.c.bf16 %v81_v45, %v78_v44  ;;  %v80_v51 = vld [vmem:[#allocation5 + $0x108] sm:$0xff] }
  0x33   :  { %385 = vmatpush1.bf16.msra.mxu0 %v384_v28  ;;  %415 = vmatprep.subr.bf16.mxu1 %v414_v30  ;;  %v79_v52 = vld [vmem:[#allocation5 + $0x100] sm:$0xff]  ;;  %v82_v53 = vld [vmem:[#allocation5 + $0x118] sm:$0xff]  ;;  %v84_v54 = vld [vmem:[#allocation5 + $0x128] sm:$0xff]  ;;  %v396_v56 = vpack.c.bf16 %v80_v51, %v77_v47 }
  0x34   :  { %387 = vmatprep.subr.bf16.mxu0 %v386_v31  ;;  %368 = vmatprep.mubr.f32.mxu1 %v43_v49  ;;  %v87_v55 = vld [vmem:[#allocation5 + $0x140] sm:$0xff]  ;;  %v426_v58 = vpack.c.bf16 %v82_v53, %v79_v52  ;;  %v86_v60 = vld [vmem:[#allocation5 + $0x138] sm:$0xff]  ;;  %v85_v61 = vld [vmem:[#allocation5 + $0x130] sm:$0xff] }
  0x35   :  { %v83_v57 = vld [vmem:[#allocation5 + $0x120] sm:$0xff]  ;;  %v398_v59 = vpack.c.bf16 %v87_v55, %v84_v54  ;;  %v88_v62 = vld [vmem:[#allocation5 + $0x148] sm:$0xff]  ;;  %v90_v63 = vld [vmem:[#allocation5 + $0x158] sm:$0xff] }
  0x36   :  { %417 = vmatpush3.bf16.msra.mxu1 %v414_v30  ;;  %v93_v1 = vld [vmem:[#allocation5 + $0x170] sm:$0xff]  ;;  %v400_v2 = vpack.c.bf16 %v86_v60, %v83_v57  ;;  %v430_v4 = vpack.c.bf16 %v88_v62, %v85_v61  ;;  %v92_v6 = vld [vmem:[#allocation5 + $0x168] sm:$0xff]  ;;  %v91_v7 = vld [vmem:[#allocation5 + $0x160] sm:$0xff] }
  0x37   :  { %389 = vmatpush1.bf16.msra.mxu0 %v388_v37  ;;  %419 = vmatprep.subr.bf16.mxu1 %v418_v39  ;;  %v89_v3 = vld [vmem:[#allocation5 + $0x150] sm:$0xff]  ;;  %v402_v5 = vpack.c.bf16 %v93_v1, %v90_v63  ;;  %v94_v8 = vld [vmem:[#allocation5 + $0x178] sm:$0xff]  ;;  %v44_v11 = vld [vmem:[#allocation2 + $0x8] sm:$0xff] }
  0x38   :  { %391 = vmatprep.subr.bf16.mxu0 %v390_v40  ;;  %v404_v9 = vpack.c.bf16 %v92_v6, %v89_v3  ;;  %v434_v10 = vpack.c.bf16 %v94_v8, %v91_v7  ;;  %v45_v12 = vld [vmem:[#allocation2 + $0x10] sm:$0xff]  ;;  %v46_v13 = vld [vmem:[#allocation2 + $0x18] sm:$0xff]  ;;  %v95_v17 = vld [vmem:[%s597_s2] sm:$0x7]  ;;  %s525_s2 = smov [#allocation7]  }
  0x39   :  { %v100_v20 = vrot.slane %v95_v17, %v99_v16  ;;  %v104_v21 = vrot.slane %v95_v17, %v103_v18  ;;  %v108_v23 = vrot.slane %v95_v17, %v107_v19  ;;  %s303_s13 = sshll.u32 %s525_s2, 4  ;;  %s304_s13 = int_to_ptr.vmem [resolvable:$true] %s303_s13 }
  0x3a   :  { %421 = vmatpush3.bf16.msra.mxu1 %v418_v39  ;;  %s490_s14 = scalar_lea.vmem %s304_s13, 1536  ;;  %p495_p3 = scmp.lt.s32.totalorder %s304_s13, %s304_s13 }
  0x3b   :  { %393 = vmatpush1.bf16.msra.mxu0 %v392_v46  ;;  %423 = vmatprep.subr.bf16.mxu1 %v422_v48  ;;  %p491_p2 = scmp.ne.s32.totalorder %s304_s13, %s490_s14  ;;  %p496_p4 = scmp.lt.s32.totalorder %s490_s14, %s490_s14 }
  0x3c   :  { %395 = vmatprep.subr.bf16.mxu0 %v394_v50 }
  0x3d   :  { %p497_p5 = por %p496_p4, %p495_p3 }
  0x3e   :  { %425 = vmatpush3.bf16.msra.mxu1 %v422_v48 }
  0x3f   :  { %397 = vmatpush1.bf16.msra.mxu0 %v396_v56  ;;  %427 = vmatprep.subr.bf16.mxu1 %v426_v58  ;;  %p498_p6 = pnand %p497_p5, %p491_p2 }
  0x40   :  { %399 = vmatprep.subr.bf16.mxu0 %v398_v59 }
  0x42   :  { %429 = vmatpush3.bf16.msra.mxu1 %v426_v58 }
  0x43   :  { %401 = vmatpush1.bf16.msra.mxu0 %v400_v2  ;;  %431 = vmatprep.subr.bf16.mxu1 %v430_v4 }
  0x44   :  { %403 = vmatprep.subr.bf16.mxu0 %v402_v5 }
  0x46   :  { %433 = vmatpush3.bf16.msra.mxu1 %v430_v4 }
  0x47   :  { %405 = vmatpush1.bf16.msra.mxu0 %v404_v9  ;;  %435 = vmatprep.subr.bf16.mxu1 %v434_v10 }
  0x4a   :  { %177 = vmatmul.mubr.f32.vlgmr.msra.gmra.mrb[0].mxu0 %v43_v49  ;;  %437 = vmatpush3.bf16.msra.mxu1 %v434_v10 }
  0x4b   :  { %182 = vmatprep.mubr.f32.mxu0 %v524_v0 }
  0x4d   :  { %369 = vmatmul.mubr.f32.vlgmr.msra.gmra.mrb[0].mxu1 %v44_v11 }
  0x4e   :  { %183 = vmatmul.mubr.f32.gmra.mrb[2].mxu0 %v44_v11  ;;  %371 = vmatprep.mubr.f32.mxu1 %v45_v12 }
  0x4f   :  { %188 = vmatprep.mubr.f32.mxu0 %v524_v0 }
  0x51   :  { %372 = vmatmul.mubr.f32.gmra.mrb[2].mxu1 %v46_v13 }
  0x52   :  { %189 = vmatmul.mubr.f32.gmra.mrb[4].mxu0 %v45_v12 }
  0x53   :  { %194 = vmatprep.mubr.f32.mxu0 %v524_v0 }
  0x56   :  { %195 = vmatmul.mubr.f32.gmra.mrb[6].mxu0 %v46_v13 }
 0x11d   :  { %v178_v22 = vpop.f32.mrb[0].mxu0 }
 0x11e   :  { %v179_v24 = vadd.f32 %v178_v22, %v100_v20  ;;  %v180_v25 = vpop.f32.mrb[1].mxu0 }
 0x11f   :  { %v181_v26 = vadd.f32 %v180_v25, %v104_v21 }
 0x120   :  { %286 = vst [vmem:[#allocation7] sm:$0xff] %v179_v24  ;;  %v370_v27 = vpop.f32.mrb[0].mxu1 }
 0x121   :  { %287 = vst [vmem:[#allocation7 + $0x8] sm:$0xff] %v181_v26  ;;  %v184_v0 = vpop.f32.mrb[2].mxu0  ;;  %v273_v28 = vadd.f32 %v370_v27, %v108_v23  ;;  %v267_v29 = vpop.f32.mrb[1].mxu1 }
 0x122   :  { %v185_v30 = vadd.f32 %v184_v0, %v100_v20  ;;  %v186_v31 = vpop.f32.mrb[3].mxu0  ;;  %v268_v32 = vadd.f32 %v267_v29, %v108_v23 }
 0x123   :  { %v187_v33 = vadd.f32 %v186_v31, %v104_v21  ;;  %291 = vst [vmem:[#allocation7 + $0x28] sm:$0xff] %v273_v28 }
 0x124   :  { %289 = vst [vmem:[#allocation7 + $0x18] sm:$0xff] %v185_v30  ;;  %288 = vst [vmem:[#allocation7 + $0x10] sm:$0xff] %v268_v32  ;;  %v373_v34 = vpop.f32.mrb[2].mxu1 }
 0x125   :  { %290 = vst [vmem:[#allocation7 + $0x20] sm:$0xff] %v187_v33  ;;  %v190_v35 = vpop.f32.mrb[4].mxu0  ;;  %v283_v36 = vadd.f32 %v373_v34, %v108_v23  ;;  %v277_v37 = vpop.f32.mrb[3].mxu1 }
 0x126   :  { %v191_v38 = vadd.f32 %v190_v35, %v100_v20  ;;  %v192_v39 = vpop.f32.mrb[5].mxu0  ;;  %v278_v40 = vadd.f32 %v277_v37, %v108_v23 }
 0x127   :  { %v193_v41 = vadd.f32 %v192_v39, %v104_v21  ;;  %297 = vst [vmem:[#allocation7 + $0x58] sm:$0xff] %v283_v36 }
 0x128   :  { %292 = vst [vmem:[#allocation7 + $0x30] sm:$0xff] %v191_v38  ;;  %294 = vst [vmem:[#allocation7 + $0x40] sm:$0xff] %v278_v40 }
 0x129   :  { %293 = vst [vmem:[#allocation7 + $0x38] sm:$0xff] %v193_v41  ;;  %v196_v42 = vpop.f32.mrb[6].mxu0 }
 0x12a   :  { %v197_v43 = vadd.f32 %v196_v42, %v100_v20  ;;  %v198_v44 = vpop.f32.mrb[7].mxu0 }
 0x12b   :  { %v199_v45 = vadd.f32 %v198_v44, %v104_v21 }
 0x12c   :  { %295 = vst [vmem:[#allocation7 + $0x48] sm:$0xff] %v197_v43 }
 0x12d   :  { %296 = vst [vmem:[#allocation7 + $0x50] sm:$0xff] %v199_v45 }
 0x12e   :  { %501 = shalt.err (!%p498_p6)
}
 0x12f   :  { %s502_s17 = scalar_lea.hbm %s598_s3, 1536 }
 0x130   :  { %p503_p7 = scmp.ne.s32.totalorder %s598_s3, %s502_s17  ;;  %p506_p8 = scmp.lt.u32.totalorder %s502_s17, %s598_s3 }
 0x132   :  { %p508_p9 = pnand %p506_p8, %p503_p7 }
 0x134   :  { %511 = shalt.err (!%p508_p9)
}
 0x135   :  { %309 = dma.vmem_to_hbm [thread:$0]  %s304_s13, 1536, %s598_s3, [#allocation4], %s522_s0, %s522_s0, %s523_s9  }
 0x136   :  { %516 = dma.done.wait [#allocation4], 1536  }
 0x137   :  { %517 = vsyncadd [#allocation4], 4294965760 }
 0x138   :  { %313 = vsyncpa [#allocation3], 1 }
 0x139   :  { %314 = vsyncpa [#allocation6], 1 }
 0x13a   :  { %315 = vsyncpa [#allocation4], 1 }

</bundles_post_ra>
